<compile_context>
chip_gen: v6e
topology: v6e:2x2x1
jax: 0.10.0
libtpu: 0.0.40
codegen_flags: <defaults>
</compile_context>

<pallas_src>
import functools
import math

import jax
import jax.numpy as jnp
from jax import lax
from jax.experimental import pallas as pl
from jax.experimental.pallas import tpu as pltpu


def _round_up(a, b):
    return (a + b - 1) // b * b


def _tpu_vmem_capacity_bytes():
    try:
        return int(pltpu.get_tpu_info().vmem_capacity_bytes)
    except Exception:
        return None


def _compiler_params(dimension_semantics, vmem_limit):
    kwargs = dict(dimension_semantics=dimension_semantics)
    if vmem_limit is not None:
        kwargs["vmem_limit_bytes"] = vmem_limit
    return pltpu.CompilerParams(**kwargs)


# --------------------------------------------------------------------------- #
# Kernel 1: MLP transform + L2 normalize + exact f32 positive-pair partials
# --------------------------------------------------------------------------- #
def _transform_kernel(x_ref, w1_ref, b1_ref, w2_ref, b2_ref, z_ref, pos_ref, *,
                      tau, pair_tile, half):
    i = pl.program_id(0)
    scale = jnp.float32(1.0 / math.sqrt(tau))

    def mlp_norm(xv):
        # Linear -> ReLU -> Linear (dropout = identity), bf16 MXU / f32 accum.
        h = jnp.dot(xv, w1_ref[...], preferred_element_type=jnp.float32)
        h = jnp.maximum(h + b1_ref[...], 0.0)
        z = jnp.dot(h.astype(jnp.bfloat16), w2_ref[...],
                    preferred_element_type=jnp.float32) + b2_ref[...]
        # F.normalize(z, p=2, dim=1) / sqrt(tau)
        sq = jnp.sum(z * z, axis=1, keepdims=True)
        inv = lax.rsqrt(jnp.maximum(sq, jnp.float32(1e-24))) * scale
        return z * inv

    # Rows appended to each half for tile alignment are zeroed so they never
    # contribute to the positive-pair sum (columns are masked in the loss kernel).
    valid = (i * pair_tile
             + lax.broadcasted_iota(jnp.int32, (pair_tile, 1), 0)) < half
    zt = jnp.where(valid, mlp_norm(x_ref[0]), 0.0)   # view 1 block, f32
    zb = jnp.where(valid, mlp_norm(x_ref[1]), 0.0)   # view 2 block, f32

    # labels[i] = (i + n/2) % n is an involution, so the summed positive logits
    # are 2 * sum of row-wise dots between paired rows (exact f32, pre-cast).
    pos_ref[i] = 2.0 * jnp.sum(zt * zb)

    z_ref[0] = zt.astype(jnp.bfloat16)
    z_ref[1] = zb.astype(jnp.bfloat16)


# --------------------------------------------------------------------------- #
# Kernel 2: flash-style online softmax over (row, col) tiles -> per-row lse
# --------------------------------------------------------------------------- #
def _loss_kernel(zr_ref, zc_ref, lse_ref, m_scr, l_scr, *,
                 row_tile, col_tile, half, half_pad, num_col_blocks):
    r = pl.program_id(0)
    c = pl.program_id(1)

    @pl.when(c == 0)
    def _():
        m_scr[...] = jnp.full_like(m_scr, -jnp.inf)
        l_scr[...] = jnp.zeros_like(l_scr)

    # sim tile = z_rows @ z_cols.T : contract dim 1 of both operands (no transpose).
    sim = lax.dot_general(zr_ref[...], zc_ref[...],
                          dimension_numbers=(((1,), (1,)), ((), ())),
                          preferred_element_type=jnp.float32)   # (row_tile, col_tile)

    row_ids = lax.broadcasted_iota(jnp.int32, sim.shape, 0) + r * row_tile
    col_ids = lax.broadcasted_iota(jnp.int32, sim.shape, 1) + c * col_tile
    # Diagonal (self-similarity) -> -1e9, as in the reference.
    sim = jnp.where(row_ids == col_ids, jnp.float32(-1e9), sim)
    if half_pad != half:
        # Columns coming from rows appended to either half -> effectively -inf.
        col_local = jnp.where(col_ids < half_pad, col_ids, col_ids - half_pad)
        sim = jnp.where(col_local < half, sim, jnp.float32(-1e30))

    m_prev = m_scr[...]
    m_new = jnp.maximum(m_prev, jnp.max(sim, axis=1, keepdims=True))
    l_scr[...] = (l_scr[...] * jnp.exp(m_prev - m_new)
                  + jnp.sum(jnp.exp(sim - m_new), axis=1, keepdims=True))
    m_scr[...] = m_new

    @pl.when(c == num_col_blocks - 1)
    def _():
        lse_ref[...] = m_scr[...] + jnp.log(l_scr[...])


# --------------------------------------------------------------------------- #
# Wrapper
# --------------------------------------------------------------------------- #
def ntxent_loss(x, w1, b1, w2, b2, *, tau=1.0):
    """x: (n, hidden). w1/w2: (hidden, hidden) stored as (in, out). b1/b2: (1, hidden)."""
    n, hidden = x.shape
    assert n % 2 == 0, "NT-Xent assumes an even batch (two views, m=2)"
    half = n // 2

    cap = _tpu_vmem_capacity_bytes()
    # ~3/4 of physical VMEM (48 MiB on v7x), capped at 96 MiB on 128 MiB chips.
    vmem_limit = None if cap is None else min(cap * 3 // 4, 96 * 1024 * 1024)

    # ---- pad hidden (contraction K) to a lane/MXU-aligned multiple of 128 ----
    h_pad = _round_up(hidden, 128)
    if h_pad != hidden:
        ph = h_pad - hidden
        x = jnp.pad(x, ((0, 0), (0, ph)))
        w1 = jnp.pad(w1, ((0, ph), (0, ph)))
        b1 = jnp.pad(b1, ((0, 0), (0, ph)))
        w2 = jnp.pad(w2, ((0, ph), (0, ph)))
        b2 = jnp.pad(b2, ((0, 0), (0, ph)))

    # ---- row tiling: each view half padded independently so that padded-layout
    #      row i pairs with row half_pad + i (the labels involution) ----
    if half > 256:
        pair_tile = 256
        half_pad = _round_up(half, pair_tile)
    else:
        pair_tile = half
        half_pad = half
    n_pad = 2 * half_pad

    x_top, x_bot = x[:half], x[half:]
    if half_pad != half:
        rp = ((0, half_pad - half), (0, 0))
        x_top, x_bot = jnp.pad(x_top, rp), jnp.pad(x_bot, rp)
    x3 = jnp.stack([x_top, x_bot], axis=0).astype(jnp.bfloat16)   # (2, half_pad, h_pad)

    num_pair_blocks = half_pad // pair_tile
    vmem_full = pl.BlockSpec(memory_space=pltpu.MemorySpace.VMEM)

    # ---- kernel 1: MLP transform + normalize (weights single-copy VMEM resident,
    #      activations pipelined over pair blocks) ----
    z3, pos_parts = pl.pallas_call(
        functools.partial(_transform_kernel, tau=float(tau),
                          pair_tile=pair_tile, half=half),
        grid=(num_pair_blocks,),
        in_specs=[
            pl.BlockSpec((2, pair_tile, h_pad), lambda i: (0, i, 0)),
            vmem_full, vmem_full, vmem_full, vmem_full,
        ],
        out_specs=(
            pl.BlockSpec((2, pair_tile, h_pad), lambda i: (0, i, 0)),
            pl.BlockSpec(memory_space=pltpu.MemorySpace.SMEM),
        ),
        out_shape=(
            jax.ShapeDtypeStruct((2, half_pad, h_pad), jnp.bfloat16),
            jax.ShapeDtypeStruct((num_pair_blocks,), jnp.float32),
        ),
        compiler_params=_compiler_params(("arbitrary",), vmem_limit),
    )(
        x3,
        w1.astype(jnp.bfloat16), b1.astype(jnp.float32),
        w2.astype(jnp.bfloat16), b2.astype(jnp.float32),
    )

    # ---- kernel 2: online softmax over (row, col) tiles of sim ----
    z2 = z3.reshape(n_pad, h_pad)          # row-major reshape, no data movement
    if half > 256:
        row_tile = 256
        col_tile = 1024 if (cap is not None and cap >= 100 * 1024 * 1024
                            and n_pad % 1024 == 0) else 512
    else:
        row_tile = n_pad                   # small batch: single tile, no padding
        col_tile = n_pad
    num_row_blocks = n_pad // row_tile
    num_col_blocks = n_pad // col_tile

    lse = pl.pallas_call(
        functools.partial(_loss_kernel, row_tile=row_tile, col_tile=col_tile,
                          half=half, half_pad=half_pad,
                          num_col_blocks=num_col_blocks),
        grid=(num_row_blocks, num_col_blocks),
        in_specs=[
            pl.BlockSpec((row_tile, h_pad), lambda r, c: (r, 0)),
            pl.BlockSpec((col_tile, h_pad), lambda r, c: (c, 0)),
        ],
        out_specs=pl.BlockSpec((row_tile, 1), lambda r, c: (r, 0)),
        out_shape=jax.ShapeDtypeStruct((n_pad, 1), jnp.float32),
        scratch_shapes=[
            pltpu.VMEM((row_tile, 1), jnp.float32),   # running row max
            pltpu.VMEM((row_tile, 1), jnp.float32),   # running row sum-exp
        ],
        compiler_params=_compiler_params(("parallel", "arbitrary"), vmem_limit),
    )(z2, z2)

    # Final reduction in the wrapper (keeps the kernel valid under a parallel
    # row axis); padded rows of each half are excluded.
    lse_sum = jnp.sum(lse.reshape(2, half_pad)[:, :half])
    pos_sum = jnp.sum(pos_parts)
    # loss = -sum_i (sim[i, label_i] - logsumexp_i) / n   (m = 2, norm = 1)
    return (lse_sum - pos_sum) / jnp.float32(n)


def _reference(x, w1, b1, w2, b2, tau=1.0):
    """Pure-JAX f32 reference mirroring the PyTorch forward (eval-mode dropout)."""
    z = jnp.maximum(x @ w1 + b1, 0.0) @ w2 + b2
    z = z / jnp.maximum(jnp.linalg.norm(z, axis=1, keepdims=True), 1e-12)
    z = z / jnp.sqrt(tau)
    n = z.shape[0]
    sim = z @ z.T
    sim = sim.at[jnp.arange(n), jnp.arange(n)].set(-1e9)
    logprob = jax.nn.log_softmax(sim, axis=1)
    labels = (jnp.arange(n) + n // 2) % n
    return -logprob[jnp.arange(n), labels].sum() / n


if __name__ == "__main__":
    # Small config consistent with the module: n = batch of 8 (two views of 4),
    # hidden_size = 32, tau = 1.0.
    n, hidden = 8, 32
    tau = 1.0

    key = jax.random.PRNGKey(0)
    kx, kw1, kb1, kw2, kb2 = jax.random.split(key, 5)

    x = jax.random.normal(kx, (n, hidden), dtype=jnp.float32)
    # Deterministic "PyTorch-like" init (uniform +/- 1/sqrt(fan_in)); weights
    # stored as (in, out) — i.e. already transposed relative to nn.Linear.
    bound = 1.0 / jnp.sqrt(jnp.float32(hidden))
    w1 = jax.random.uniform(kw1, (hidden, hidden), jnp.float32, -bound, bound)
    b1 = jax.random.uniform(kb1, (1, hidden), jnp.float32, -bound, bound)
    w2 = jax.random.uniform(kw2, (hidden, hidden), jnp.float32, -bound, bound)
    b2 = jax.random.uniform(kb2, (1, hidden), jnp.float32, -bound, bound)

    loss = ntxent_loss(x, w1, b1, w2, b2, tau=tau)
    loss = jax.block_until_ready(loss)

    ref = _reference(x, w1, b1, w2, b2, tau=tau)
    # bf16 MXU operands (f32 accumulation; f32 normalize/softmax/positive logits)
    # => loosened tolerance vs the pure-f32 reference.
    assert jnp.allclose(loss, ref, atol=3e-2, rtol=3e-2), (loss, ref)

    print("KERNEL_OK")
</pallas_src>

<mosaic_0001>
module attributes {stable_mosaic.version = 11 : i64} {
  func.func @_transform_kernel(%arg0: i32, %arg1: memref<2x4x128xbf16, #tpu.memory_space<vmem>>, %arg2: memref<128x128xbf16, #tpu.memory_space<vmem>>, %arg3: memref<1x128xf32, #tpu.memory_space<vmem>>, %arg4: memref<128x128xbf16, #tpu.memory_space<vmem>>, %arg5: memref<1x128xf32, #tpu.memory_space<vmem>>, %arg6: memref<2x4x128xbf16, #tpu.memory_space<vmem>>, %arg7: memref<1xf32, #tpu.memory_space<smem>>) attributes {dimension_semantics = [#tpu.dimension_semantics<arbitrary>], iteration_bounds = array<i64: 1>, scalar_prefetch = 0 : i64, scratch_operands = 0 : i64, tpu.core_type = #tpu.core_type<tc>, window_params = [{transform_indices = @transform_0, window_bounds = array<i64: 2, 4, 128>}, {pipeline_mode = #tpu.pipeline_mode<synchronous>, transform_indices = @transform_1, window_bounds = array<i64: 128, 128>}, {pipeline_mode = #tpu.pipeline_mode<synchronous>, transform_indices = @transform_2, window_bounds = array<i64: 1, 128>}, {pipeline_mode = #tpu.pipeline_mode<synchronous>, transform_indices = @transform_3, window_bounds = array<i64: 128, 128>}, {pipeline_mode = #tpu.pipeline_mode<synchronous>, transform_indices = @transform_4, window_bounds = array<i64: 1, 128>}, {transform_indices = @transform_5, window_bounds = array<i64: 2, 4, 128>}, {transform_indices = @transform_6, window_bounds = array<i64: 1>}]} {
    %c4_i32 = arith.constant 4 : i32
    %0 = arith.muli %arg0, %c4_i32 : i32
    %1 = tpu.iota {dimensions = array<i32: 0>} : vector<4x1xi32>
    %2 = vector.broadcast %0 : i32 to vector<4x1xi32>
    %3 = arith.addi %2, %1 : vector<4x1xi32>
    %c4_i32_0 = arith.constant 4 : i32
    %4 = vector.broadcast %c4_i32_0 : i32 to vector<4x1xi32>
    %5 = arith.cmpi slt, %3, %4 : vector<4x1xi32>
    %c0 = arith.constant 0 : index
    %c0_1 = arith.constant 0 : index
    %c0_2 = arith.constant 0 : index
    %6 = vector.load %arg1[%c0, %c0_1, %c0_2] : memref<2x4x128xbf16, #tpu.memory_space<vmem>>, vector<1x4x128xbf16>
    %7 = vector.shape_cast %6 : vector<1x4x128xbf16> to vector<4x128xbf16>
    %c0_3 = arith.constant 0 : index
    %c0_4 = arith.constant 0 : index
    %8 = vector.load %arg2[%c0_3, %c0_4] : memref<128x128xbf16, #tpu.memory_space<vmem>>, vector<128x128xbf16>
    %cst = arith.constant dense<0.000000e+00> : vector<4x128xf32>
    %9 = tpu.matmul %7, %8, %cst {dimension_numbers = #tpu.dot_dimension_numbers<[1], [0], [0], [1], [0, 0, 1, 1], [], []>} : vector<4x128xbf16>, vector<128x128xbf16>, vector<4x128xf32> -> vector<4x128xf32>
    %c0_5 = arith.constant 0 : index
    %c0_6 = arith.constant 0 : index
    %10 = vector.load %arg3[%c0_5, %c0_6] : memref<1x128xf32, #tpu.memory_space<vmem>>, vector<1x128xf32>
    %11 = vector.broadcast %10 : vector<1x128xf32> to vector<4x128xf32>
    %12 = arith.addf %9, %11 : vector<4x128xf32>
    %cst_7 = arith.constant 0.000000e+00 : f32
    %13 = vector.broadcast %cst_7 : f32 to vector<4x128xf32>
    %14 = arith.maximumf %12, %13 : vector<4x128xf32>
    %15 = arith.truncf %14 : vector<4x128xf32> to vector<4x128xbf16>
    %c0_8 = arith.constant 0 : index
    %c0_9 = arith.constant 0 : index
    %16 = vector.load %arg4[%c0_8, %c0_9] : memref<128x128xbf16, #tpu.memory_space<vmem>>, vector<128x128xbf16>
    %cst_10 = arith.constant dense<0.000000e+00> : vector<4x128xf32>
    %17 = tpu.matmul %15, %16, %cst_10 {dimension_numbers = #tpu.dot_dimension_numbers<[1], [0], [0], [1], [0, 0, 1, 1], [], []>} : vector<4x128xbf16>, vector<128x128xbf16>, vector<4x128xf32> -> vector<4x128xf32>
    %c0_11 = arith.constant 0 : index
    %c0_12 = arith.constant 0 : index
    %18 = vector.load %arg5[%c0_11, %c0_12] : memref<1x128xf32, #tpu.memory_space<vmem>>, vector<1x128xf32>
    %19 = vector.broadcast %18 : vector<1x128xf32> to vector<4x128xf32>
    %20 = arith.addf %17, %19 : vector<4x128xf32>
    %21 = arith.mulf %20, %20 : vector<4x128xf32>
    %cst_13 = arith.constant dense<0.000000e+00> : vector<4xf32>
    %22 = vector.multi_reduction <add>, %21, %cst_13 [1] : vector<4x128xf32> to vector<4xf32>
    %23 = vector.shape_cast %22 : vector<4xf32> to vector<4x1xf32>
    %cst_14 = arith.constant 1.000000e-24 : f32
    %24 = vector.broadcast %cst_14 : f32 to vector<4x1xf32>
    %25 = arith.maximumf %23, %24 : vector<4x1xf32>
    %26 = math.rsqrt %25 : vector<4x1xf32>
    %cst_15 = arith.constant 1.000000e+00 : f32
    %27 = vector.broadcast %cst_15 : f32 to vector<4x1xf32>
    %28 = arith.mulf %26, %27 : vector<4x1xf32>
    %29 = vector.broadcast %28 : vector<4x1xf32> to vector<4x128xf32>
    %30 = arith.mulf %20, %29 : vector<4x128xf32>
    %cst_16 = arith.constant 0.000000e+00 : f32
    %31 = vector.shape_cast %5 : vector<4x1xi1> to vector<4x1xi1>
    %32 = vector.broadcast %31 : vector<4x1xi1> to vector<4x128xi1>
    %33 = vector.broadcast %cst_16 : f32 to vector<4x128xf32>
    %34 = arith.select %32, %30, %33 : vector<4x128xi1>, vector<4x128xf32>
    %c1 = arith.constant 1 : index
    %c0_17 = arith.constant 0 : index
    %c0_18 = arith.constant 0 : index
    %35 = vector.load %arg1[%c1, %c0_17, %c0_18] : memref<2x4x128xbf16, #tpu.memory_space<vmem>>, vector<1x4x128xbf16>
    %36 = vector.shape_cast %35 : vector<1x4x128xbf16> to vector<4x128xbf16>
    %c0_19 = arith.constant 0 : index
    %c0_20 = arith.constant 0 : index
    %37 = vector.load %arg2[%c0_19, %c0_20] : memref<128x128xbf16, #tpu.memory_space<vmem>>, vector<128x128xbf16>
    %cst_21 = arith.constant dense<0.000000e+00> : vector<4x128xf32>
    %38 = tpu.matmul %36, %37, %cst_21 {dimension_numbers = #tpu.dot_dimension_numbers<[1], [0], [0], [1], [0, 0, 1, 1], [], []>} : vector<4x128xbf16>, vector<128x128xbf16>, vector<4x128xf32> -> vector<4x128xf32>
    %c0_22 = arith.constant 0 : index
    %c0_23 = arith.constant 0 : index
    %39 = vector.load %arg3[%c0_22, %c0_23] : memref<1x128xf32, #tpu.memory_space<vmem>>, vector<1x128xf32>
    %40 = vector.broadcast %39 : vector<1x128xf32> to vector<4x128xf32>
    %41 = arith.addf %38, %40 : vector<4x128xf32>
    %cst_24 = arith.constant 0.000000e+00 : f32
    %42 = vector.broadcast %cst_24 : f32 to vector<4x128xf32>
    %43 = arith.maximumf %41, %42 : vector<4x128xf32>
    %44 = arith.truncf %43 : vector<4x128xf32> to vector<4x128xbf16>
    %c0_25 = arith.constant 0 : index
    %c0_26 = arith.constant 0 : index
    %45 = vector.load %arg4[%c0_25, %c0_26] : memref<128x128xbf16, #tpu.memory_space<vmem>>, vector<128x128xbf16>
    %cst_27 = arith.constant dense<0.000000e+00> : vector<4x128xf32>
    %46 = tpu.matmul %44, %45, %cst_27 {dimension_numbers = #tpu.dot_dimension_numbers<[1], [0], [0], [1], [0, 0, 1, 1], [], []>} : vector<4x128xbf16>, vector<128x128xbf16>, vector<4x128xf32> -> vector<4x128xf32>
    %c0_28 = arith.constant 0 : index
    %c0_29 = arith.constant 0 : index
    %47 = vector.load %arg5[%c0_28, %c0_29] : memref<1x128xf32, #tpu.memory_space<vmem>>, vector<1x128xf32>
    %48 = vector.broadcast %47 : vector<1x128xf32> to vector<4x128xf32>
    %49 = arith.addf %46, %48 : vector<4x128xf32>
    %50 = arith.mulf %49, %49 : vector<4x128xf32>
    %cst_30 = arith.constant dense<0.000000e+00> : vector<4xf32>
    %51 = vector.multi_reduction <add>, %50, %cst_30 [1] : vector<4x128xf32> to vector<4xf32>
    %52 = vector.shape_cast %51 : vector<4xf32> to vector<4x1xf32>
    %cst_31 = arith.constant 1.000000e-24 : f32
    %53 = vector.broadcast %cst_31 : f32 to vector<4x1xf32>
    %54 = arith.maximumf %52, %53 : vector<4x1xf32>
    %55 = math.rsqrt %54 : vector<4x1xf32>
    %cst_32 = arith.constant 1.000000e+00 : f32
    %56 = vector.broadcast %cst_32 : f32 to vector<4x1xf32>
    %57 = arith.mulf %55, %56 : vector<4x1xf32>
    %58 = vector.broadcast %57 : vector<4x1xf32> to vector<4x128xf32>
    %59 = arith.mulf %49, %58 : vector<4x128xf32>
    %cst_33 = arith.constant 0.000000e+00 : f32
    %60 = vector.shape_cast %5 : vector<4x1xi1> to vector<4x1xi1>
    %61 = vector.broadcast %60 : vector<4x1xi1> to vector<4x128xi1>
    %62 = vector.broadcast %cst_33 : f32 to vector<4x128xf32>
    %63 = arith.select %61, %59, %62 : vector<4x128xi1>, vector<4x128xf32>
    %64 = arith.mulf %34, %63 : vector<4x128xf32>
    %65 = vector.shape_cast %64 : vector<4x128xf32> to vector<1x4x128xf32>
    %cst_34 = arith.constant dense<0.000000e+00> : vector<1xf32>
    %66 = vector.multi_reduction <add>, %65, %cst_34 [1, 2] : vector<1x4x128xf32> to vector<1xf32>
    %67 = vector.shape_cast %66 : vector<1xf32> to vector<1x1x1xf32>
    %68 = vector.extract %67[0, 0, 0] : f32 from vector<1x1x1xf32>
    %cst_35 = arith.constant 2.000000e+00 : f32
    %69 = arith.mulf %cst_35, %68 : f32
    %70 = arith.index_cast %arg0 : i32 to index
    %71 = memref.load %arg7[%70] : memref<1xf32, #tpu.memory_space<smem>>
    memref.store %69, %arg7[%70] : memref<1xf32, #tpu.memory_space<smem>>
    %72 = arith.truncf %34 : vector<4x128xf32> to vector<4x128xbf16>
    %c0_36 = arith.constant 0 : index
    %c0_37 = arith.constant 0 : index
    %c0_38 = arith.constant 0 : index
    %73 = vector.load %arg6[%c0_36, %c0_37, %c0_38] : memref<2x4x128xbf16, #tpu.memory_space<vmem>>, vector<1x4x128xbf16>
    %74 = vector.shape_cast %73 : vector<1x4x128xbf16> to vector<4x128xbf16>
    %75 = vector.shape_cast %72 : vector<4x128xbf16> to vector<1x4x128xbf16>
    tpu.vector_store %arg6[%c0_36, %c0_37, %c0_38], %75 {strides = array<i32>} : memref<2x4x128xbf16, #tpu.memory_space<vmem>>, vector<1x4x128xbf16>,
    %76 = arith.truncf %63 : vector<4x128xf32> to vector<4x128xbf16>
    %c1_39 = arith.constant 1 : index
    %c0_40 = arith.constant 0 : index
    %c0_41 = arith.constant 0 : index
    %77 = vector.load %arg6[%c1_39, %c0_40, %c0_41] : memref<2x4x128xbf16, #tpu.memory_space<vmem>>, vector<1x4x128xbf16>
    %78 = vector.shape_cast %77 : vector<1x4x128xbf16> to vector<4x128xbf16>
    %79 = vector.shape_cast %76 : vector<4x128xbf16> to vector<1x4x128xbf16>
    tpu.vector_store %arg6[%c1_39, %c0_40, %c0_41], %79 {strides = array<i32>} : memref<2x4x128xbf16, #tpu.memory_space<vmem>>, vector<1x4x128xbf16>,
    return
  }
  func.func @transform_0(%arg0: i32) -> (i32, i32, i32) {
    %c0_i32 = arith.constant 0 : i32
    %c0_i32_0 = arith.constant 0 : i32
    %c0_i32_1 = arith.constant 0 : i32
    return %c0_i32, %arg0, %c0_i32_0 : i32, i32, i32
  }
  func.func @transform_1(%arg0: i32) -> (i32, i32) {
    %c0_i32 = arith.constant 0 : i32
    %c0_i32_0 = arith.constant 0 : i32
    %c0_i32_1 = arith.constant 0 : i32
    return %c0_i32, %c0_i32_0 : i32, i32
  }
  func.func @transform_2(%arg0: i32) -> (i32, i32) {
    %c0_i32 = arith.constant 0 : i32
    %c0_i32_0 = arith.constant 0 : i32
    %c0_i32_1 = arith.constant 0 : i32
    return %c0_i32, %c0_i32_0 : i32, i32
  }
  func.func @transform_3(%arg0: i32) -> (i32, i32) {
    %c0_i32 = arith.constant 0 : i32
    %c0_i32_0 = arith.constant 0 : i32
    %c0_i32_1 = arith.constant 0 : i32
    return %c0_i32, %c0_i32_0 : i32, i32
  }
  func.func @transform_4(%arg0: i32) -> (i32, i32) {
    %c0_i32 = arith.constant 0 : i32
    %c0_i32_0 = arith.constant 0 : i32
    %c0_i32_1 = arith.constant 0 : i32
    return %c0_i32, %c0_i32_0 : i32, i32
  }
  func.func @transform_5(%arg0: i32) -> (i32, i32, i32) {
    %c0_i32 = arith.constant 0 : i32
    %c0_i32_0 = arith.constant 0 : i32
    %c0_i32_1 = arith.constant 0 : i32
    return %c0_i32, %arg0, %c0_i32_0 : i32, i32, i32
  }
  func.func @transform_6(%arg0: i32) -> i32 {
    %c0_i32 = arith.constant 0 : i32
    %c0_i32_0 = arith.constant 0 : i32
    return %c0_i32 : i32
  }
}

</mosaic_0001>

<bundles_post_ra>
// kernel: tpu_custom_call.1
= control target key start
LH: loop header
LB: loop body
LE: loop exit
PB: predicated region body
PF: predicated region fallthrough
CT: control target
= control target key end

     0   :  { %12 = vsyncpa [#allocation3], 0  ;;  %s841_s0 = inlined_call_operand.hbm [shape: bf16[2,4,128], index: 0, kind: input, shape index: {}]   ;;  %s842_s1 = inlined_call_operand.hbm [shape: bf16[128,128], index: 1, kind: input, shape index: {}]   ;;  %s843_s2 = inlined_call_operand.vmem [shape: f32[1,128], index: 2, kind: input, shape index: {}]   ;;  %s844_s3 = inlined_call_operand.hbm [shape: bf16[128,128], index: 3, kind: input, shape index: {}]   ;;  %s845_s4 = inlined_call_operand.vmem [shape: f32[1,128], index: 4, kind: input, shape index: {}]   ;;  %s846_s5 = inlined_call_operand.hbm [shape: bf16[2,4,128], index: 5, kind: output, shape index: {0}]   ;;  %s847_s6 = inlined_call_operand.hbm [shape: f32[1], index: 6, kind: output, shape index: {1}]  }
   0x1   :  { %13 = vsyncpa [#allocation7], 0 }
   0x2   :  { %14 = vsyncpa [#allocation4], 0 }
   0x3   :  { %15 = vsyncpa [#allocation5], 0  ;;  %s713_s21 = smov [#allocation6]  }
   0x4   :  { %s33_s22 = sshll.u32 %s713_s21, 4  ;;  %s34_s22 = int_to_ptr.vmem [resolvable:$true] %s33_s22 }
   0x5   :  { %s625_s23 = scalar_lea.vmem %s34_s22, 1024  ;;  %p630_p1 = scmp.lt.s32.totalorder %s34_s22, %s34_s22 }
   0x6   :  { %p626_p0 = scmp.ne.s32.totalorder %s34_s22, %s625_s23  ;;  %p631_p2 = scmp.lt.s32.totalorder %s625_s23, %s625_s23 }
   0x8   :  { %p632_p3 = por %p631_p2, %p630_p1 }
   0xa   :  { %p633_p4 = pnand %p632_p3, %p626_p0 }
   0xc   :  { %636 = shalt.err (!%p633_p4)
}
   0xd   :  { %s714_s24 = smov 64   ;;  %s715_s25 = smov 4  }
   0xe   :  { %39 = dma.hbm_to_vmem [thread:$0]  %s842_s1, 1024, %s34_s22, [#allocation7], %s714_s24, %s714_s24, %s715_s25  }
   0xf   :  { %s716_s28 = smov [#allocation2]  }
  0x10   :  { %s21_s29 = sshll.u32 %s716_s28, 4  ;;  %s22_s29 = int_to_ptr.vmem [resolvable:$true] %s21_s29 }
  0x11   :  { %s645_s30 = scalar_lea.vmem %s22_s29, 64  ;;  %p650_p6 = scmp.lt.s32.totalorder %s22_s29, %s22_s29 }
  0x12   :  { %p646_p5 = scmp.ne.s32.totalorder %s22_s29, %s645_s30  ;;  %p651_p7 = scmp.lt.s32.totalorder %s645_s30, %s645_s30 }
  0x14   :  { %p652_p8 = por %p651_p7, %p650_p6 }
  0x16   :  { %p653_p9 = pnand %p652_p8, %p646_p5 }
  0x18   :  { %656 = shalt.err (!%p653_p9)
}
  0x19   :  { %s717_s7 = smov 32   ;;  %s718_s8 = smov 2  }
  0x1a   :  { %27 = dma.hbm_to_vmem [thread:$0]  %s841_s0, 64, %s22_s29, [#allocation3], %s717_s7, %s717_s7, %s718_s8  }
  0x1b   :  { %s719_s1 = smov [#allocation8]  }
  0x1c   :  { %s47_s11 = sshll.u32 %s719_s1, 4  ;;  %s48_s11 = int_to_ptr.vmem [resolvable:$true] %s47_s11 }
  0x1d   :  { %s665_s12 = scalar_lea.vmem %s48_s11, 1024  ;;  %p670_p11 = scmp.lt.s32.totalorder %s48_s11, %s48_s11 }
  0x1e   :  { %p666_p10 = scmp.ne.s32.totalorder %s48_s11, %s665_s12  ;;  %p671_p12 = scmp.lt.s32.totalorder %s665_s12, %s665_s12 }
  0x20   :  { %p672_p13 = por %p671_p12, %p670_p11 }
  0x22   :  { %p673_p0 = pnand %p672_p13, %p666_p10 }
  0x24   :  { %676 = shalt.err (!%p673_p0)
}
  0x25   :  { %53 = dma.hbm_to_vmem [thread:$0]  %s844_s3, 1024, %s48_s11, [#allocation7], %s714_s24, %s714_s24, %s715_s25  }
  0x26   :  { %705 = dma.done.wait [#allocation3], 64  }
  0x27   :  { %706 = vsyncadd [#allocation3], 4294967232 }
  0x28   :  { %707 = dma.done.wait [#allocation7], 2048  }
  0x29   :  { %708 = vsyncadd [#allocation7], 4294965248  ;;  %v720_v0 = vmov 0.0   ;;  %vm721_vm0 = vmmov 0   ;;  %v597_v1 = vld [vmem:[#allocation6 + $0x38] sm:$0xff]   ;;  %v598_v2 = vld [vmem:[#allocation6 + $0x30] sm:$0xff]   ;;  %v67_v51 = vlaneseq }
  0x2a   :  { %504 = vmatprep.subr.bf16.mxu0 %v720_v0  ;;  %520 = vmatprep.mubr.msk.bf16.mxu0 %vm721_vm0, %v720_v0  ;;  %v599_v3 = vld [vmem:[#allocation6 + $0x28] sm:$0xff]   ;;  %v779_v4 = vld [vmem:[#allocation8 + $0x38] sm:$0xff]   ;;  %v600_v5 = vld [vmem:[#allocation6 + $0x20] sm:$0xff]   ;;  %vm298_vm1 = vcmask 1043456  }
  0x2b   :  { %524 = vmatprep.subr.bf16.mxu1 %v720_v0  ;;  %540 = vmatprep.mubr.msk.bf16.mxu1 %vm721_vm0, %v720_v0  ;;  %v783_v6 = vld [vmem:[#allocation8 + $0x30] sm:$0xff]   ;;  %v601_v7 = vld [vmem:[#allocation6 + $0x18] sm:$0xff]   ;;  %v786_v8 = vld [vmem:[#allocation8 + $0x28] sm:$0xff]   ;;  %v68_v52 = vshrl.u32 %v67_v51, 7 }
  0x2c   :  { %505 = vmatpush3.bf16.msra.mxu0 %v597_v1  ;;  %525 = vmatpush3.bf16.msra.mxu1 %v779_v4  ;;  %v602_v9 = vld [vmem:[#allocation6 + $0x10] sm:$0xff]   ;;  %v608_v10 = vld [vmem:[#allocation8 + $0x20] sm:$0xff]   ;;  %v603_v11 = vld [vmem:[#allocation6 + $0x8] sm:$0xff]  }
  0x2d   :  { %506 = vmatprep.subr.bf16.mxu0 %v720_v0  ;;  %526 = vmatprep.subr.bf16.mxu1 %v720_v0  ;;  %v609_v12 = vld [vmem:[#allocation8 + $0x18] sm:$0xff]   ;;  %v604_v13 = vld [vmem:[#allocation6] sm:$0xff]   ;;  %v610_v14 = vld [vmem:[#allocation8 + $0x10] sm:$0xff]   ;;  %vm71_vm2 = vcmp.lt.s32.totalorder %v68_v52, 4 }
  0x2e   :  { %v72_v15 = vld [vmem:[#allocation2] sm:$0x3]  ;;  %v309_v16 = vld [vmem:[#allocation2 + $0x2] sm:$0x3]  ;;  %v611_v17 = vld [vmem:[#allocation8 + $0x8] sm:$0xff]  }
  0x2f   :  { %v612_v18 = vld [vmem:[#allocation8] sm:$0xff]   ;;  %v450_v19 = vld [vmem:[%s843_s2] ss:$0 sm:$0xff] }
  0x30   :  { %507 = vmatpush3.bf16.msra.mxu0 %v598_v2  ;;  %527 = vmatpush3.bf16.msra.mxu1 %v783_v6  ;;  %v459_v34 = vld [vmem:[%s845_s4] ss:$0 sm:$0xff]  ;;  %s722_s4 = smov [#allocation9]  }
  0x31   :  { %508 = vmatprep.subr.bf16.mxu0 %v720_v0  ;;  %528 = vmatprep.subr.bf16.mxu1 %v720_v0  ;;  %s424_s16 = sshll.u32 %s722_s4, 4  ;;  %s425_s16 = int_to_ptr.vmem [resolvable:$true] %s424_s16 }
  0x32   :  { %s677_s17 = scalar_lea.vmem %s425_s16, 64  ;;  %p682_p2 = scmp.lt.s32.totalorder %s425_s16, %s425_s16 }
  0x33   :  { %p678_p1 = scmp.ne.s32.totalorder %s425_s16, %s677_s17  ;;  %p683_p3 = scmp.lt.s32.totalorder %s677_s17, %s677_s17 }
  0x34   :  { %509 = vmatpush3.bf16.msra.mxu0 %v599_v3  ;;  %529 = vmatpush3.bf16.msra.mxu1 %v786_v8 }
  0x35   :  { %510 = vmatprep.subr.bf16.mxu0 %v720_v0  ;;  %530 = vmatprep.subr.bf16.mxu1 %v720_v0  ;;  %p684_p4 = por %p683_p3, %p682_p2 }
  0x37   :  { %p685_p5 = pnand %p684_p4, %p678_p1 }
  0x38   :  { %511 = vmatpush3.bf16.msra.mxu0 %v600_v5  ;;  %531 = vmatpush3.bf16.msra.mxu1 %v608_v10 }
  0x39   :  { %512 = vmatprep.subr.bf16.mxu0 %v720_v0  ;;  %532 = vmatprep.subr.bf16.mxu1 %v720_v0 }
  0x3c   :  { %513 = vmatpush3.bf16.msra.mxu0 %v601_v7  ;;  %533 = vmatpush3.bf16.msra.mxu1 %v609_v12 }
  0x3d   :  { %514 = vmatprep.subr.bf16.mxu0 %v720_v0  ;;  %534 = vmatprep.subr.bf16.mxu1 %v720_v0 }
  0x40   :  { %515 = vmatpush3.bf16.msra.mxu0 %v602_v9  ;;  %535 = vmatpush3.bf16.msra.mxu1 %v610_v14 }
  0x41   :  { %516 = vmatprep.subr.bf16.mxu0 %v720_v0  ;;  %536 = vmatprep.subr.bf16.mxu1 %v720_v0 }
  0x44   :  { %517 = vmatpush3.bf16.msra.mxu0 %v603_v11  ;;  %537 = vmatpush3.bf16.msra.mxu1 %v611_v17 }
  0x45   :  { %518 = vmatprep.subr.bf16.mxu0 %v720_v0  ;;  %538 = vmatprep.subr.bf16.mxu1 %v720_v0 }
  0x48   :  { %519 = vmatpush3.bf16.msra.mxu0 %v604_v13  ;;  %539 = vmatpush3.bf16.msra.mxu1 %v612_v18 }
  0x49   :  { %544 = vmatprep.subr.bf16.mxu0 %v720_v0  ;;  %564 = vmatprep.subr.bf16.mxu1 %v720_v0 }
  0x4b   :  { %521 = vmatmul.mubr.bf16.vlgmr.msra.gmra.mxu0 %v72_v15 }
  0x4c   :  { %545 = vmatpush3.bf16.msra.mxu0 %v597_v1  ;;  %560 = vmatprep.mubr.msk.bf16.mxu0 %vm721_vm0, %v720_v0 }
  0x4d   :  { %546 = vmatprep.subr.bf16.mxu0 %v720_v0 }
  0x50   :  { %547 = vmatpush3.bf16.msra.mxu0 %v598_v2 }
  0x51   :  { %548 = vmatprep.subr.bf16.mxu0 %v720_v0 }
  0x54   :  { %549 = vmatpush3.bf16.msra.mxu0 %v599_v3 }
  0x55   :  { %550 = vmatprep.subr.bf16.mxu0 %v720_v0 }
  0x58   :  { %551 = vmatpush3.bf16.msra.mxu0 %v600_v5 }
  0x59   :  { %552 = vmatprep.subr.bf16.mxu0 %v720_v0 }
  0x5c   :  { %553 = vmatpush3.bf16.msra.mxu0 %v601_v7 }
  0x5d   :  { %554 = vmatprep.subr.bf16.mxu0 %v720_v0 }
  0x60   :  { %555 = vmatpush3.bf16.msra.mxu0 %v602_v9 }
  0x61   :  { %556 = vmatprep.subr.bf16.mxu0 %v720_v0 }
  0x64   :  { %557 = vmatpush3.bf16.msra.mxu0 %v603_v11 }
  0x65   :  { %558 = vmatprep.subr.bf16.mxu0 %v720_v0 }
  0x68   :  { %559 = vmatpush3.bf16.msra.mxu0 %v604_v13 }
  0x6b   :  { %561 = vmatmul.mubr.bf16.vlgmr.msra.gmra.mxu0 %v309_v16 }
 0x10b   :  { %v178_v20 = vpop.f32.mrf.mxu0 }
 0x10c   :  { %v179_v21 = vadd.f32 %v450_v19, %v178_v20 }
 0x10d   :  { %v522_v22 = vpop.f32.mrf.mxu0 }
 0x10e   :  { %v184_v23 = vmax.f32 %v179_v21, 0.0 }
 0x10f   :  { %v181_v24 = vpop.f32.mrf.mxu0 }
 0x110   :  { %v185_v25 = vpack.c.bf16 %v184_v23, %v184_v23 }
 0x111   :  { %v523_v26 = vpop.f32.mrf.mxu0 }
 0x112   :  { %541 = vmatmul.mubr.bf16.vlgmr.msra.gmra.mxu1 %v185_v25 }
 0x113   :  { %565 = vmatpush3.bf16.msra.mxu1 %v779_v4  ;;  %580 = vmatprep.mubr.msk.bf16.mxu1 %vm721_vm0, %v720_v0 }
 0x114   :  { %566 = vmatprep.subr.bf16.mxu1 %v720_v0 }
 0x117   :  { %567 = vmatpush3.bf16.msra.mxu1 %v783_v6 }
 0x118   :  { %568 = vmatprep.subr.bf16.mxu1 %v720_v0 }
 0x11b   :  { %569 = vmatpush3.bf16.msra.mxu1 %v786_v8 }
 0x11c   :  { %570 = vmatprep.subr.bf16.mxu1 %v720_v0 }
 0x11f   :  { %571 = vmatpush3.bf16.msra.mxu1 %v608_v10 }
 0x120   :  { %572 = vmatprep.subr.bf16.mxu1 %v720_v0 }
 0x123   :  { %573 = vmatpush3.bf16.msra.mxu1 %v609_v12 }
 0x124   :  { %574 = vmatprep.subr.bf16.mxu1 %v720_v0 }
 0x127   :  { %575 = vmatpush3.bf16.msra.mxu1 %v610_v14 }
 0x128   :  { %576 = vmatprep.subr.bf16.mxu1 %v720_v0 }
 0x12b   :  { %v344_v27 = vpop.f32.mrf.mxu0  ;;  %577 = vmatpush3.bf16.msra.mxu1 %v611_v17 }
 0x12c   :  { %v345_v28 = vadd.f32 %v450_v19, %v344_v27  ;;  %578 = vmatprep.subr.bf16.mxu1 %v720_v0 }
 0x12d   :  { %v562_v29 = vpop.f32.mrf.mxu0 }
 0x12e   :  { %v350_v30 = vmax.f32 %v345_v28, 0.0 }
 0x12f   :  { %v347_v31 = vpop.f32.mrf.mxu0  ;;  %579 = vmatpush3.bf16.msra.mxu1 %v612_v18 }
 0x130   :  { %v351_v32 = vpack.c.bf16 %v350_v30, %v350_v30 }
 0x131   :  { %v563_v33 = vpop.f32.mrf.mxu0 }
 0x132   :  { %581 = vmatmul.mubr.bf16.vlgmr.msra.gmra.mxu1 %v351_v32 }
 0x1d2   :  { %v291_v35 = vpop.f32.mrf.mxu1 }
 0x1d3   :  { %v292_v36 = vadd.f32 %v459_v34, %v291_v35 }
 0x1d4   :  { %v542_v37 = vpop.f32.mrf.mxu1 }
 0x1d5   :  { %v297_v38 = vmul.f32 %v292_v36, %v292_v36 }
 0x1d6   :  { %v294_v39 = vpop.f32.mrf.mxu1 }
 0x1d7   :  { %v299_v40 = vsel %vm298_vm1, %v297_v38, 0.0 }
 0x1d8   :  { %300 = vadd.xlane.f32.xlu0 %v299_v40  ;;  %v543_v41 = vpop.f32.mrf.mxu1 }
 0x1f2   :  { %v386_v42 = vpop.f32.mrf.mxu1 }
 0x1f3   :  { %v387_v43 = vadd.f32 %v459_v34, %v386_v42 }
 0x1f4   :  { %v582_v44 = vpop.f32.mrf.mxu1 }
 0x1f5   :  { %v392_v45 = vmul.f32 %v387_v43, %v387_v43 }
 0x1f6   :  { %v389_v46 = vpop.f32.mrf.mxu1 }
 0x1f7   :  { %v393_v47 = vsel %vm298_vm1, %v392_v45, 0.0 }
 0x1f8   :  { %394 = vadd.xlane.f32.xlu0 %v393_v47  ;;  %v583_v48 = vpop.f32.mrf.mxu1 }
 0x261   :  { %v301_v49 = vpop.xlane.xlu0 %300 }
 0x262   :  { %v302_v50 = vmax.f32 %v301_v49, 1e-24 }
 0x264   :  { %613 = vrsqrt.f32 %v302_v50 }
 0x271   :  { %v614_v53 = vpop.eup %613 }
 0x272   :  { %v304_v54 = vmul.f32 %v614_v53, %v292_v36 }
 0x274   :  { %v307_v55 = vsel %vm71_vm2, %v304_v54, 0.0 }
 0x275   :  { %v414_v56 = vpack.c.bf16 %v307_v55, %v307_v55 }
 0x277   :  { %415 = vst [vmem:[#allocation9] sm:$0x3] %v414_v56 }
 0x281   :  { %v395_v57 = vpop.xlane.xlu0 %394 }
 0x282   :  { %v396_v58 = vmax.f32 %v395_v57, 1e-24 }
 0x284   :  { %615 = vrsqrt.f32 %v396_v58 }
 0x291   :  { %v616_v59 = vpop.eup %615 }
 0x292   :  { %v398_v60 = vmul.f32 %v616_v59, %v387_v43 }
 0x294   :  { %v399_v61 = vsel %vm71_vm2, %v398_v60, 0.0 }
 0x295   :  { %v400_v62 = vmul.f32 %v399_v61, %v307_v55  ;;  %v416_v63 = vpack.c.bf16 %v399_v61, %v399_v61 }
 0x297   :  { %v401_v0 = vsel %vm298_vm1, %v400_v62, 0.0  ;;  %418 = vst [vmem:[#allocation9 + $0x2] sm:$0x3] %v416_v63 }
 0x298   :  { %402 = vadd.xlane.f32.xlu1 %v401_v0 }
 0x299   :  { %688 = shalt.err (!%p685_p5)
}
 0x29a   :  { %430 = dma.vmem_to_hbm [thread:$0]  %s425_s16, 64, %s846_s5, [#allocation4], %s717_s7, %s717_s7, %s718_s8  }
 0x29b   :  { %s723_s22 = smov [#allocation10]  }
 0x321   :  { %v403_v1 = vpop.xlane.xlu1 %402 }
 0x322   :  { %v404_v2 = vrot.slane %v403_v1, 4 }
 0x324   :  { %v405_v3 = vadd.f32 %v404_v2, %v403_v1 }
 0x326   :  { %v406_v4 = vrot.slane %v405_v3, 2 }
 0x328   :  { %v407_v5 = vadd.f32 %v406_v4, %v405_v3 }
 0x32a   :  { %v408_v6 = vrot.slane %v407_v5, 1 }
 0x32c   :  { %v409_v7 = vadd.f32 %v408_v6, %v407_v5 }
 0x32e   :  { %584 = vpush %v409_v7 }
 0x35f   :  { %s585_s20 = spop %584 }
 0x360   :  { %s411_s21 = smul.f32 2.0, %s585_s20 }
 0x362   :  { %413 = sst [smem:[#allocation10]] %s411_s21 }
 0x363   :  { %438 = dma.smem_to_hbm %s723_s22, 16, %s847_s6, [#allocation5]  }
 0x364   :  { %709 = dma.done.wait [#allocation4], 64  }
 0x365   :  { %710 = vsyncadd [#allocation4], 4294967232 }
 0x366   :  { %711 = dma.done.wait [#allocation5], 16  }
 0x367   :  { %712 = vsyncadd [#allocation5], 4294967280 }
 0x368   :  { %445 = sfence }
 0x369   :  { %446 = vsyncpa [#allocation3], 1 }
 0x36a   :  { %447 = vsyncpa [#allocation7], 1 }
 0x36b   :  { %448 = vsyncpa [#allocation4], 1 }
 0x36c   :  { %449 = vsyncpa [#allocation5], 1 }

</bundles_post_ra>
